<compile_context>
chip_gen: v6e
topology: v6e:2x2x1
jax: 0.10.0
libtpu: 0.0.40
codegen_flags: <defaults>
</compile_context>

<pallas_src>
import jax
import jax.numpy as jnp
from jax import lax
from jax.experimental import pallas as pl
from jax.experimental.pallas import tpu as pltpu


def _round_up(x, m):
    return (x + m - 1) // m * m


def cgd_fused_kernel(x_ref, wbd_ref, bcat_ref, wht_ref, bht_ref, out_ref):
    # One lane-dense bf16 matmul covers all Pv partition Linears at once
    # (f32 accumulation on the MXU); biases are added in f32.
    h = jnp.maximum(
        jnp.dot(x_ref[...], wbd_ref[...], preferred_element_type=jnp.float32)
        + bcat_ref[...],
        0.0,
    ).astype(jnp.bfloat16)
    # Output matmul, computed transposed: contract the hidden dim of BOTH
    # operands so the result is (n_out_pad, tb) -- a lane-dense store 8x
    # smaller than the (tb, 128)-zero-padded alternative.
    out_t = lax.dot_general(
        wht_ref[...], h,
        dimension_numbers=(((1,), (1,)), ((), ())),
        preferred_element_type=jnp.float32,
    )
    out_ref[...] = (out_t + bht_ref[...]).astype(out_ref.dtype)


def reference_forward(x, wv, bv, wh, bh):
    """Pure-JAX f32 reference matching the PyTorch forward (torch layouts)."""
    B = x.shape[0]
    Pv, n_H, d_part = wv.shape
    xp = x.reshape(B, Pv, d_part)
    h = jnp.zeros((B, n_H), jnp.float32)
    for i in range(Pv):
        h = h + jax.nn.relu(xp[:, i] @ wv[i].T + bv[i])
    return h @ wh.T + bh


def cgd_model_fc_forward(x, wv, bv, wh, bh, *, batch_tile=512, force_pallas=False):
    """Fused CGD_model_fc forward.

    Args (PyTorch nn.Linear layout):
      x : (B, Pv*d_part) f32
      wv: (Pv, n_H, d_part)   per-partition Linear weights
      bv: (Pv, n_H)           per-partition Linear biases
      wh: (n_out, n_H)        output Linear weight
      bh: (n_out,)            output Linear bias
    Returns (B, n_out) f32.

    batch_tile: max batch tile. Keep <= 512 on v7x (64 MiB VMEM); 1024 is a
    good choice on v5e/v6e (128 MiB) for large B.
    """
    B, in_len = x.shape
    Pv, n_H, d_part = wv.shape
    n_out = wh.shape[0]
    assert in_len == Pv * d_part

    # Tiny batches: a <128-row LHS underfills the MXU and the ~0.35us per-step
    # overhead dominates -- plain XLA wins. force_pallas keeps the kernel path
    # testable at toy shapes.
    if B < 128 and not force_pallas:
        return reference_forward(x, wv, bv, wh, bh)

    # ---------------- wrapper-side weight layout (traced once) ----------------
    H = Pv * n_H
    H_pad = _round_up(H, 128)    # lane-dense hidden width (prefer real multiples
                                 # of 256 on v6e/v7x for full MXU-pass fill)
    N_sub = _round_up(n_out, 8)  # sublane-padded rows of the transposed output

    # Guard the Pv^2-scaling block-diagonal weight: it must stay comfortably
    # VMEM-resident (v7x has only 64 MiB physical VMEM per TensorCore).
    if (in_len * H_pad + N_sub * H_pad) * 2 > (16 << 20):
        # TODO(synk): tile W_bd columns over an 'arbitrary' hidden grid axis (or
        # per-partition accumulation) once Pv*n_H outgrows VMEM; use XLA for now.
        return reference_forward(x, wv, bv, wh, bh)

    w_bd = jnp.zeros((in_len, H_pad), jnp.float32)
    for i in range(Pv):
        w_bd = w_bd.at[i * d_part:(i + 1) * d_part,
                       i * n_H:(i + 1) * n_H].set(wv[i].T)
    b_cat = jnp.zeros((1, H_pad), jnp.float32).at[0, :H].set(bv.reshape(-1))
    # Summing the Pv partition outputs == multiplying the concatenated hidden
    # activations by Wh tiled Pv times along the hidden dim (kept transposed).
    wh_t = jnp.zeros((N_sub, H_pad), jnp.float32).at[:n_out, :H].set(
        jnp.tile(wh, (1, Pv)))
    bh_t = jnp.zeros((N_sub, 1), jnp.float32).at[:n_out, 0].set(bh)

    # bf16 streamed operands; biases stay f32 (added after f32 accumulation).
    x_bf = x.astype(jnp.bfloat16)
    w_bd = w_bd.astype(jnp.bfloat16)
    wh_t = wh_t.astype(jnp.bfloat16)

    # ---------------- batch tiling ----------------
    batch_tile = max(128, _round_up(batch_tile, 128))
    # tb multiple of 128 keeps the transposed output store lane-dense; aim for
    # >=2 tiles when the batch allows so v7x's two TensorCores split the work.
    if B <= 128:
        tb = 128
    else:
        tb = min(batch_tile, _round_up(pl.cdiv(B, 2), 128))
    B_pad = _round_up(B, tb)
    if B_pad != B:
        # NOTE: padded rows compute ReLU(b_cat)@Wh_t + bh garbage; they are
        # sliced off below -- do not add input_output_aliases without masking.
        x_bf = jnp.pad(x_bf, ((0, B_pad - B), (0, 0)))
    n_tiles = B_pad // tb

    # ---------------- explicit VMEM budget (with headroom) ----------------
    resident = (in_len * H_pad * 2 + H_pad * 4        # W_bd (bf16) + b_cat (f32)
                + N_sub * H_pad * 2 + N_sub * 4)      # Wh_t (bf16) + bh_t (f32)
    streamed = 2 * (tb * in_len * 2 + N_sub * tb * 4)  # double-buffered x in / out
    scratch = tb * H_pad * (4 + 2)                     # f32 h + its bf16 cast
    vmem_limit = int(min(64 << 20,
                         max(32 << 20, 2 * (resident + streamed + scratch))))

    one_buf = pl.Buffered(1)  # grid-invariant weights: single VMEM copy, no re-DMA
    grid_spec = pltpu.PrefetchScalarGridSpec(
        num_scalar_prefetch=0,
        grid=(n_tiles,),
        in_specs=[
            pl.BlockSpec((tb, in_len), lambda i: (i, 0)),        # x batch tile
            pl.BlockSpec((in_len, H_pad), lambda i: (0, 0), pipeline_mode=one_buf),
            pl.BlockSpec((1, H_pad), lambda i: (0, 0), pipeline_mode=one_buf),
            pl.BlockSpec((N_sub, H_pad), lambda i: (0, 0), pipeline_mode=one_buf),
            pl.BlockSpec((N_sub, 1), lambda i: (0, 0), pipeline_mode=one_buf),
        ],
        out_specs=pl.BlockSpec((N_sub, tb), lambda i: (0, i)),   # transposed, lane-dense
    )

    out_t_pad = pl.pallas_call(
        cgd_fused_kernel,
        out_shape=jax.ShapeDtypeStruct((N_sub, B_pad), jnp.float32),
        grid_spec=grid_spec,
        compiler_params=pltpu.CompilerParams(
            dimension_semantics=("parallel",),
            vmem_limit_bytes=vmem_limit),
    )(x_bf, w_bd, b_cat, wh_t, bh_t)

    # Un-transpose + strip padding (tiny (n_out, B) slab; cheap in XLA).
    return out_t_pad[:n_out, :B].T


def init_params(key, Pv, d_part, n_H, n_out=10):
    """torch.nn.Linear-style init (uniform +-1/sqrt(fan_in)), torch layouts."""
    keys = jax.random.split(key, 4)
    bound_v = 1.0 / jnp.sqrt(d_part)
    bound_h = 1.0 / jnp.sqrt(n_H)
    wv = jax.random.uniform(keys[0], (Pv, n_H, d_part), jnp.float32, -bound_v, bound_v)
    bv = jax.random.uniform(keys[1], (Pv, n_H), jnp.float32, -bound_v, bound_v)
    wh = jax.random.uniform(keys[2], (n_out, n_H), jnp.float32, -bound_h, bound_h)
    bh = jax.random.uniform(keys[3], (n_out,), jnp.float32, -bound_h, bound_h)
    return wv, bv, wh, bh


if __name__ == "__main__":
    # Small shapes consistent with the module: Pv partitions of a flat input.
    B, Pv, d_part, n_H = 8, 4, 16, 32
    in_length = Pv * d_part

    key = jax.random.PRNGKey(0)
    kx, kp = jax.random.split(key)
    x = jax.random.normal(kx, (B, in_length), jnp.float32)
    wv, bv, wh, bh = init_params(kp, Pv, d_part, n_H)

    # force_pallas=True so the toy-shape smoke test actually exercises the
    # kernel (production callers at B < 128 get the cheaper XLA fallback).
    out = cgd_model_fc_forward(x, wv, bv, wh, bh, force_pallas=True)
    out = jax.block_until_ready(out)

    ref = reference_forward(x, wv, bv, wh, bh)
    assert out.shape == (B, 10)
    # bf16 operands with f32 accumulation -> loosened tolerance vs f32 reference.
    assert jnp.allclose(out, ref, atol=3e-2, rtol=3e-2), (
        float(jnp.max(jnp.abs(out - ref))))

    print("KERNEL_OK")
</pallas_src>

<mosaic_0001>
module attributes {stable_mosaic.version = 11 : i64} {
  func.func @cgd_fused_kernel(%arg0: i32, %arg1: memref<128x64xbf16, #tpu.memory_space<vmem>>, %arg2: memref<64x128xbf16, #tpu.memory_space<vmem>>, %arg3: memref<1x128xf32, #tpu.memory_space<vmem>>, %arg4: memref<16x128xbf16, #tpu.memory_space<vmem>>, %arg5: memref<16x1xf32, #tpu.memory_space<vmem>>, %arg6: memref<16x128xf32, #tpu.memory_space<vmem>>) attributes {dimension_semantics = [#tpu.dimension_semantics<parallel>], iteration_bounds = array<i64: 1>, scalar_prefetch = 0 : i64, scratch_operands = 0 : i64, tpu.core_type = #tpu.core_type<tc>, window_params = [{transform_indices = @transform_0, window_bounds = array<i64: 128, 64>}, {pipeline_mode = #tpu.pipeline_mode<synchronous>, transform_indices = @transform_1, window_bounds = array<i64: 64, 128>}, {pipeline_mode = #tpu.pipeline_mode<synchronous>, transform_indices = @transform_2, window_bounds = array<i64: 1, 128>}, {pipeline_mode = #tpu.pipeline_mode<synchronous>, transform_indices = @transform_3, window_bounds = array<i64: 16, 128>}, {pipeline_mode = #tpu.pipeline_mode<synchronous>, transform_indices = @transform_4, window_bounds = array<i64: 16, 1>}, {transform_indices = @transform_5, window_bounds = array<i64: 16, 128>}]} {
    %c0 = arith.constant 0 : index
    %c0_0 = arith.constant 0 : index
    %0 = vector.load %arg1[%c0, %c0_0] : memref<128x64xbf16, #tpu.memory_space<vmem>>, vector<128x64xbf16>
    %c0_1 = arith.constant 0 : index
    %c0_2 = arith.constant 0 : index
    %1 = vector.load %arg2[%c0_1, %c0_2] : memref<64x128xbf16, #tpu.memory_space<vmem>>, vector<64x128xbf16>
    %cst = arith.constant dense<0.000000e+00> : vector<128x128xf32>
    %2 = tpu.matmul %0, %1, %cst {dimension_numbers = #tpu.dot_dimension_numbers<[1], [0], [0], [1], [0, 0, 1, 1], [], []>} : vector<128x64xbf16>, vector<64x128xbf16>, vector<128x128xf32> -> vector<128x128xf32>
    %c0_3 = arith.constant 0 : index
    %c0_4 = arith.constant 0 : index
    %3 = vector.load %arg3[%c0_3, %c0_4] : memref<1x128xf32, #tpu.memory_space<vmem>>, vector<1x128xf32>
    %4 = vector.broadcast %3 : vector<1x128xf32> to vector<128x128xf32>
    %5 = arith.addf %2, %4 : vector<128x128xf32>
    %cst_5 = arith.constant 0.000000e+00 : f32
    %6 = vector.broadcast %cst_5 : f32 to vector<128x128xf32>
    %7 = arith.maximumf %5, %6 : vector<128x128xf32>
    %8 = arith.truncf %7 : vector<128x128xf32> to vector<128x128xbf16>
    %c0_6 = arith.constant 0 : index
    %c0_7 = arith.constant 0 : index
    %9 = vector.load %arg4[%c0_6, %c0_7] : memref<16x128xbf16, #tpu.memory_space<vmem>>, vector<16x128xbf16>
    %cst_8 = arith.constant dense<0.000000e+00> : vector<16x128xf32>
    %10 = tpu.matmul %9, %8, %cst_8 {dimension_numbers = #tpu.dot_dimension_numbers<[1], [1], [0], [0], [0, 0, 1, 0], [], []>} : vector<16x128xbf16>, vector<128x128xbf16>, vector<16x128xf32> -> vector<16x128xf32>
    %c0_9 = arith.constant 0 : index
    %c0_10 = arith.constant 0 : index
    %11 = vector.load %arg5[%c0_9, %c0_10] : memref<16x1xf32, #tpu.memory_space<vmem>>, vector<16x1xf32>
    %12 = vector.broadcast %11 : vector<16x1xf32> to vector<16x128xf32>
    %13 = arith.addf %10, %12 : vector<16x128xf32>
    %c0_11 = arith.constant 0 : index
    %c0_12 = arith.constant 0 : index
    %14 = vector.load %arg6[%c0_11, %c0_12] : memref<16x128xf32, #tpu.memory_space<vmem>>, vector<16x128xf32>
    tpu.vector_store %arg6[%c0_11, %c0_12], %13 {strides = array<i32>} : memref<16x128xf32, #tpu.memory_space<vmem>>, vector<16x128xf32>,
    return
  }
  func.func @transform_0(%arg0: i32) -> (i32, i32) {
    %c0_i32 = arith.constant 0 : i32
    %c0_i32_0 = arith.constant 0 : i32
    return %arg0, %c0_i32 : i32, i32
  }
  func.func @transform_1(%arg0: i32) -> (i32, i32) {
    %c0_i32 = arith.constant 0 : i32
    %c0_i32_0 = arith.constant 0 : i32
    %c0_i32_1 = arith.constant 0 : i32
    return %c0_i32, %c0_i32_0 : i32, i32
  }
  func.func @transform_2(%arg0: i32) -> (i32, i32) {
    %c0_i32 = arith.constant 0 : i32
    %c0_i32_0 = arith.constant 0 : i32
    %c0_i32_1 = arith.constant 0 : i32
    return %c0_i32, %c0_i32_0 : i32, i32
  }
  func.func @transform_3(%arg0: i32) -> (i32, i32) {
    %c0_i32 = arith.constant 0 : i32
    %c0_i32_0 = arith.constant 0 : i32
    %c0_i32_1 = arith.constant 0 : i32
    return %c0_i32, %c0_i32_0 : i32, i32
  }
  func.func @transform_4(%arg0: i32) -> (i32, i32) {
    %c0_i32 = arith.constant 0 : i32
    %c0_i32_0 = arith.constant 0 : i32
    %c0_i32_1 = arith.constant 0 : i32
    return %c0_i32, %c0_i32_0 : i32, i32
  }
  func.func @transform_5(%arg0: i32) -> (i32, i32) {
    %c0_i32 = arith.constant 0 : i32
    %c0_i32_0 = arith.constant 0 : i32
    return %c0_i32, %arg0 : i32, i32
  }
}

</mosaic_0001>

<bundles_post_ra>
// kernel: tpu_custom_call.1
= control target key start
LH: loop header
LB: loop body
LE: loop exit
PB: predicated region body
PF: predicated region fallthrough
CT: control target
= control target key end

     0   :  { %vm117_vm0 = vcmask 523264   ;;  %s575_s0 = inlined_call_operand.vmem [shape: bf16[128,64], index: 0, kind: input, shape index: {}]   ;;  %s576_s1 = inlined_call_operand.vmem [shape: bf16[64,128], index: 1, kind: input, shape index: {}]   ;;  %s577_s2 = inlined_call_operand.vmem [shape: f32[1,128], index: 2, kind: input, shape index: {}]   ;;  %s578_s3 = inlined_call_operand.vmem [shape: bf16[16,128], index: 3, kind: input, shape index: {}]   ;;  %s579_s4 = inlined_call_operand.vmem [shape: f32[16,1], index: 4, kind: input, shape index: {}]   ;;  %s580_s5 = inlined_call_operand.hbm [shape: f32[16,128], index: 5, kind: output, shape index: {}]  }
   0x1   :  { %v436_v0 = vld [vmem:[%s576_s1 + $0x18] sm:$0xff]   ;;  %v437_v1 = vld [vmem:[%s576_s1 + $0x10] sm:$0xff]   ;;  %v438_v2 = vld [vmem:[%s576_s1 + $0x8] sm:$0xff]  }
   0x2   :  { %385 = vmatprep.subr.bf16.mxu0 %v436_v0  ;;  %v440_v3 = vld [vmem:[%s575_s0] sm:$0xff]  }
   0x3   :  { %386 = vmatpush3.bf16.msra.mxu0 %v436_v0  ;;  %393 = vmatprep.mubr.msk.bf16.mxu0 %vm117_vm0, %v440_v3  ;;  %v439_v4 = vld [vmem:[%s576_s1] sm:$0xff]  }
   0x4   :  { %387 = vmatprep.subr.bf16.mxu0 %v437_v1 }
   0x7   :  { %388 = vmatpush3.bf16.msra.mxu0 %v437_v1 }
   0x8   :  { %389 = vmatprep.subr.bf16.mxu0 %v438_v2 }
   0xb   :  { %390 = vmatpush3.bf16.msra.mxu0 %v438_v2 }
   0xc   :  { %391 = vmatprep.subr.bf16.mxu0 %v439_v4 }
   0xd   :  { %10 = vsyncpa [#allocation3], 0  ;;  %v441_v5 = vld [vmem:[%s575_s0 + $0x8] sm:$0xff]   ;;  %v442_v6 = vld [vmem:[%s575_s0 + $0x10] sm:$0xff]   ;;  %v471_v12 = vmov 0.0   ;;  %vm472_vm1 = vmmov 0  }
   0xe   :  { %v443_v7 = vld [vmem:[%s575_s0 + $0x18] sm:$0xff]   ;;  %v444_v8 = vld [vmem:[%s575_s0 + $0x20] sm:$0xff]   ;;  %v445_v9 = vld [vmem:[%s575_s0 + $0x28] sm:$0xff]   ;;  %409 = vmatprep.subr.bf16.mxu1 %v471_v12  ;;  %425 = vmatprep.mubr.msk.bf16.mxu1 %vm472_vm1, %v471_v12  ;;  %v473_v14 = vmov 0   ;;  %s474_s21 = smov [#allocation2]  }
   0xf   :  { %392 = vmatpush3.bf16.msra.mxu0 %v439_v4  ;;  %v446_v10 = vld [vmem:[%s575_s0 + $0x30] sm:$0xff]   ;;  %v447_v11 = vld [vmem:[%s575_s0 + $0x38] sm:$0xff]   ;;  %v265_v13 = vld [vmem:[%s579_s4] sm:$0xff]  ;;  %435 = vset.pattern.permute.xlu0 %v473_v14  ;;  %s331_s22 = sshll.u32 %s474_s21, 4  ;;  %s332_s22 = int_to_ptr.vmem [resolvable:$true] %s331_s22 }
  0x10   :  { %269 = vperm.xlu0 %435, %v265_v13   ;;  %v266_v15 = vld [vmem:[%s579_s4 + $0x8] sm:$0xff]  ;;  %v342_v17 = vld [vmem:[%s577_s2] ss:$0 sm:$0xff]  ;;  %s449_s23 = scalar_lea.vmem %s332_s22, 256  ;;  %p454_p1 = scmp.lt.s32.totalorder %s332_s22, %s332_s22 }
  0x11   :  { %p450_p0 = scmp.ne.s32.totalorder %s332_s22, %s449_s23  ;;  %p455_p2 = scmp.lt.s32.totalorder %s449_s23, %s449_s23 }
  0x12   :  { %394 = vmatmul.mubr.msk.bf16.vlgmr.msra.gmra.mxu0 %vm117_vm0, %v441_v5 }
  0x13   :  { %397 = vmatprep.mubr.msk.bf16.mxu0 %vm117_vm0, %v442_v6  ;;  %p456_p3 = por %p455_p2, %p454_p1 }
  0x14   :  { %274 = vperm.xlu0 %435, %v266_v15  }
  0x15   :  { %p457_p4 = pnand %p456_p3, %p450_p0 }
  0x1a   :  { %398 = vmatmul.mubr.msk.bf16.gmra.mxu0 %vm117_vm0, %v443_v7 }
  0x1b   :  { %401 = vmatprep.mubr.msk.bf16.mxu0 %vm117_vm0, %v444_v8 }
  0x22   :  { %402 = vmatmul.mubr.msk.bf16.gmra.mxu0 %vm117_vm0, %v445_v9  ;;  %v448_v9 = vld [vmem:[%s578_s3] sm:$0xff]  }
  0x23   :  { %405 = vmatprep.mubr.msk.bf16.mxu0 %vm117_vm0, %v446_v10 }
  0x2a   :  { %406 = vmatmul.mubr.msk.bf16.gmra.mxu0 %vm117_vm0, %v447_v11 }
  0x8b   :  { %v270_v10 = vpop.permute.xlu0 %269 }
  0x8f   :  { %v275_v15 = vpop.permute.xlu0 %274 }
  0xd2   :  { %v395_v16 = vpop.f32.mrf.mxu0 }
  0xd3   :  { %v185_v19 = vadd.f32 %v395_v16, %v342_v17 }
  0xd4   :  { %v176_v18 = vpop.f32.mrf.mxu0 }
  0xd5   :  { %v177_v21 = vadd.f32 %v342_v17, %v176_v18  ;;  %v241_v24 = vmax.f32 %v185_v19, 0.0 }
  0xd6   :  { %v396_v20 = vpop.f32.mrf.mxu0 }
  0xd7   :  { %v188_v22 = vadd.f32 %v396_v20, %v342_v17  ;;  %v239_v28 = vmax.f32 %v177_v21, 0.0 }
  0xd8   :  { %v179_v23 = vpop.f32.mrf.mxu0 }
  0xd9   :  { %v242_v25 = vmax.f32 %v188_v22, 0.0  ;;  %v180_v26 = vadd.f32 %v342_v17, %v179_v23 }
  0xda   :  { %v399_v27 = vpop.f32.mrf.mxu0 }
  0xdb   :  { %v256_v29 = vpack.c.bf16 %v242_v25, %v241_v24  ;;  %v240_v30 = vmax.f32 %v180_v26, 0.0  ;;  %v201_v0 = vadd.f32 %v399_v27, %v342_v17 }
  0xdc   :  { %v192_v31 = vpop.f32.mrf.mxu0 }
  0xdd   :  { %v255_v32 = vpack.c.bf16 %v240_v30, %v239_v28  ;;  %v245_v2 = vmax.f32 %v201_v0, 0.0  ;;  %v193_v5 = vadd.f32 %v342_v17, %v192_v31 }
  0xde   :  { %v400_v33 = vpop.f32.mrf.mxu0 }
  0xdf   :  { %v204_v62 = vadd.f32 %v400_v33, %v342_v17  ;;  %v243_v7 = vmax.f32 %v193_v5, 0.0 }
  0xe0   :  { %v195_v34 = vpop.f32.mrf.mxu0 }
  0xe1   :  { %v246_v1 = vmax.f32 %v204_v62, 0.0  ;;  %v196_v4 = vadd.f32 %v342_v17, %v195_v34 }
  0xe2   :  { %v403_v35 = vpop.f32.mrf.mxu0 }
  0xe3   :  { %v217_v54 = vadd.f32 %v403_v35, %v342_v17  ;;  %v258_v3 = vpack.c.bf16 %v246_v1, %v245_v2  ;;  %v244_v6 = vmax.f32 %v196_v4, 0.0 }
  0xe4   :  { %v208_v36 = vpop.f32.mrf.mxu0 }
  0xe5   :  { %v249_v56 = vmax.f32 %v217_v54, 0.0  ;;  %v209_v59 = vadd.f32 %v342_v17, %v208_v36  ;;  %v257_v8 = vpack.c.bf16 %v244_v6, %v243_v7 }
  0xe6   :  { %v404_v37 = vpop.f32.mrf.mxu0 }
  0xe7   :  { %v220_v52 = vadd.f32 %v404_v37, %v342_v17  ;;  %v247_v61 = vmax.f32 %v209_v59, 0.0 }
  0xe8   :  { %v211_v38 = vpop.f32.mrf.mxu0 }
  0xe9   :  { %v250_v55 = vmax.f32 %v220_v52, 0.0  ;;  %v212_v58 = vadd.f32 %v342_v17, %v211_v38 }
  0xea   :  { %v407_v39 = vpop.f32.mrf.mxu0 }
  0xeb   :  { %v233_v41 = vadd.f32 %v407_v39, %v342_v17  ;;  %v260_v57 = vpack.c.bf16 %v250_v55, %v249_v56  ;;  %v248_v60 = vmax.f32 %v212_v58, 0.0 }
  0xec   :  { %v224_v40 = vpop.f32.mrf.mxu0 }
  0xed   :  { %v253_v45 = vmax.f32 %v233_v41, 0.0  ;;  %v225_v49 = vadd.f32 %v342_v17, %v224_v40  ;;  %v259_v63 = vpack.c.bf16 %v248_v60, %v247_v61 }
  0xee   :  { %v408_v42 = vpop.f32.mrf.mxu0 }
  0xef   :  { %v236_v43 = vadd.f32 %v408_v42, %v342_v17  ;;  %v251_v51 = vmax.f32 %v225_v49, 0.0 }
  0xf0   :  { %v227_v44 = vpop.f32.mrf.mxu0 }
  0xf1   :  { %v254_v46 = vmax.f32 %v236_v43, 0.0  ;;  %v228_v47 = vadd.f32 %v342_v17, %v227_v44 }
  0xf3   :  { %v262_v48 = vpack.c.bf16 %v254_v46, %v253_v45  ;;  %v252_v50 = vmax.f32 %v228_v47, 0.0 }
  0xf5   :  { %410 = vmatpush3.bf16.xpose.msra.mxu1 %v262_v48  ;;  %v261_v53 = vpack.c.bf16 %v252_v50, %v251_v51 }
  0xf6   :  { %411 = vmatprep.subr.bf16.mxu1 %v471_v12 }
  0xfd   :  { %412 = vmatpush3.bf16.xpose.msra.mxu1 %v261_v53 }
  0xfe   :  { %413 = vmatprep.subr.bf16.mxu1 %v471_v12 }
 0x105   :  { %414 = vmatpush3.bf16.xpose.msra.mxu1 %v260_v57 }
 0x106   :  { %415 = vmatprep.subr.bf16.mxu1 %v471_v12 }
 0x10d   :  { %416 = vmatpush3.bf16.xpose.msra.mxu1 %v259_v63 }
 0x10e   :  { %417 = vmatprep.subr.bf16.mxu1 %v471_v12 }
 0x115   :  { %418 = vmatpush3.bf16.xpose.msra.mxu1 %v258_v3 }
 0x116   :  { %419 = vmatprep.subr.bf16.mxu1 %v471_v12 }
 0x11d   :  { %420 = vmatpush3.bf16.xpose.msra.mxu1 %v257_v8 }
 0x11e   :  { %421 = vmatprep.subr.bf16.mxu1 %v471_v12 }
 0x125   :  { %422 = vmatpush3.bf16.xpose.msra.mxu1 %v256_v29 }
 0x126   :  { %423 = vmatprep.subr.bf16.mxu1 %v471_v12 }
 0x12d   :  { %424 = vmatpush3.bf16.xpose.msra.mxu1 %v255_v32 }
 0x134   :  { %426 = vmatmul.mubr.bf16.vlgmr.msra.gmra.mxu1 %v448_v9 }
 0x1f4   :  { %v317_v11 = vpop.f32.mrf.mxu1 }
 0x1f5   :  { %v318_v13 = vadd.f32 %v317_v11, %v270_v10 }
 0x1f6   :  { %v427_v14 = vpop.f32.mrf.mxu1 }
 0x1f7   :  { %324 = vst [vmem:[#allocation2] sm:$0xff] %v318_v13 }
 0x1f8   :  { %v320_v16 = vpop.f32.mrf.mxu1 }
 0x1f9   :  { %v321_v17 = vadd.f32 %v320_v16, %v275_v15 }
 0x1fa   :  { %v428_v18 = vpop.f32.mrf.mxu1 }
 0x1fb   :  { %325 = vst [vmem:[#allocation2 + $0x8] sm:$0xff] %v321_v17 }
 0x1fc   :  { %460 = shalt.err (!%p457_p4)
}
 0x1fd   :  { %s475_s3 = smov 128   ;;  %s476_s24 = smov 8  }
 0x1fe   :  { %337 = dma.vmem_to_hbm [thread:$0]  %s332_s22, 256, %s580_s5, [#allocation3], %s475_s3, %s475_s3, %s476_s24  }
 0x1ff   :  { %469 = dma.done.wait [#allocation3], 256  }
 0x200   :  { %470 = vsyncadd [#allocation3], 4294967040 }
 0x201   :  { %341 = vsyncpa [#allocation3], 1 }

</bundles_post_ra>
